<compile_context>
chip_gen: v7x
topology: tpu7x:2x2x1
jax: 0.10.0
libtpu: 0.0.40
codegen_flags: <defaults>
</compile_context>

<pallas_src>
import jax
import jax.numpy as jnp
from jax.experimental import pallas as pl
from jax.experimental.pallas import tpu as pltpu

# --- model hyper-parameters (module defaults) ---
BATCH = 8
INPUT_DIM = 16
BLOCK_DIM = 32          # D
OUTPUT_DIM = 4
OUT_PAD = 128           # lane-dense output width (sliced back in the wrapper)
NUM_BLOCKS = 2
TAU = 0.2
LN_EPS = 1e-5


# ----------------------------------------------------------------------------
# Pallas kernel: full forward pass (one batch tile per grid point)
# ----------------------------------------------------------------------------
def rune_forward_kernel(x_ref, wi_ref, bi_ref, wtrop_ref, wg_ref, wpr_ref,
                        wvec_ref, wo_ref, bo_ref, o_ref):
    D = BLOCK_DIM
    inv_tau = 1.0 / TAU
    tb = x_ref.shape[0]

    # input_projection: Linear(INPUT_DIM -> D); bf16 operands, f32 accumulation
    h = (jnp.dot(x_ref[...].astype(jnp.bfloat16), wi_ref[...],
                 preferred_element_type=jnp.float32) + bi_ref[...])        # (TB, D)

    # lane bookkeeping for the merged 2D-wide tropical path (hoisted out of the loop)
    lane = jax.lax.broadcasted_iota(jnp.int32, (tb, 2 * D), 1)
    is_lo = lane < D                               # first D lanes = max-plus half
    sgn = jnp.where(is_lo, 1.0, -1.0)              # (+1 | -1), f32

    # stacked RUNE blocks (static unroll; NUM_BLOCKS is a compile-time const)
    for blk in range(NUM_BLOCKS):
        wtrop = wtrop_ref[blk]                     # (2D, 2D) bf16 block-diag tables
        wg = wg_ref[blk]                           # (D, 2D)  bf16 gate weight
        wpr = wpr_ref[blk]                         # (2D, D)  bf16 projection weight
        vecs = wvec_ref[blk]                       # (8, 2D)  f32 packed row vectors
        mrow = vecs[0:1, :]                        # [rowmax(Wp)/tau | rowmax(-Wm)/tau]
        bg_row = vecs[1:2, :]                      # gate bias (1, 2D)
        bpr_row = vecs[2:3, :D]                    # projection bias (1, D)
        gamma = vecs[3:4, :D]                      # LayerNorm gamma
        beta = vecs[4:5, :D]                       # LayerNorm beta

        # ---- merged tropical max/min: stable logsumexp as one 2D-wide matmul ----
        hx = h * inv_tau                                           # (TB, D)
        mx = jnp.max(hx, axis=-1, keepdims=True)                   # (TB, 1)
        mn = jnp.min(hx, axis=-1, keepdims=True)                   # (TB, 1); max(-hx) == -mn
        hcat = jnp.concatenate([hx, -hx], axis=-1)                 # (TB, 2D)
        shift = jnp.where(is_lo, mx, -mn)                          # per-half row max
        excat = jnp.exp(hcat - shift).astype(jnp.bfloat16)         # values in (0, 1]
        s = jnp.dot(excat, wtrop, preferred_element_type=jnp.float32)   # (TB, 2D)
        tvals = sgn * (TAU * (shift + mrow + jnp.log(s)))          # [trop_max | trop_min]

        # feats = [tmax - tmin | tmax + tmin] via one rotate-half lane swap
        swapped = jnp.concatenate([tvals[:, D:], tvals[:, :D]], axis=-1)  # [tmin | tmax]
        feats = tvals - sgn * swapped                              # (TB, 2D)

        # ---- gate (D -> 2D), full width, bf16 operands ----
        gate = jax.nn.sigmoid(
            jnp.dot(h.astype(jnp.bfloat16), wg,
                    preferred_element_type=jnp.float32) + bg_row)  # (TB, 2D)

        # ---- projection (2D -> D), dropout == identity, residual ----
        agg = (gate * feats).astype(jnp.bfloat16)
        proj = jnp.dot(agg, wpr, preferred_element_type=jnp.float32) + bpr_row
        y = h + proj                                               # (TB, D)

        # ---- LayerNorm over the feature dim, single-pass statistics ----
        s1 = jnp.sum(y, axis=-1, keepdims=True)
        s2 = jnp.sum(y * y, axis=-1, keepdims=True)
        mu = s1 * (1.0 / D)
        var = s2 * (1.0 / D) - mu * mu
        h = (y - mu) * jax.lax.rsqrt(var + LN_EPS) * gamma + beta

    # output_head: Linear(D -> OUTPUT_DIM), f32, lane-dense 128-wide padded store
    o_ref[...] = (jnp.dot(h, wo_ref[...], preferred_element_type=jnp.float32)
                  + bo_ref[...])


# ----------------------------------------------------------------------------
# One-time parameter preparation: hoist all weight-only math off the hot path
# ----------------------------------------------------------------------------
def prepare_params(params):
    wi, bi, wp, wm, wg, bg, wpr, bpr, gamma, beta, wo, bo = params
    inv_tau = 1.0 / TAU
    D, NB = BLOCK_DIM, NUM_BLOCKS

    # tropical tables: exp-shifted, pre-transposed to (j, i), merged block-diagonally
    mwp = jnp.max(wp * inv_tau, axis=-1, keepdims=True)             # (NB, D, 1)
    ewp_t = jnp.swapaxes(jnp.exp(wp * inv_tau - mwp), -1, -2)       # (NB, D, D)
    mwm = jnp.max(-wm * inv_tau, axis=-1, keepdims=True)
    ewm_t = jnp.swapaxes(jnp.exp(-wm * inv_tau - mwm), -1, -2)
    z = jnp.zeros((NB, D, D), jnp.float32)
    wtrop = jnp.concatenate(
        [jnp.concatenate([ewp_t, z], axis=-1),
         jnp.concatenate([z, ewm_t], axis=-1)], axis=-2).astype(jnp.bfloat16)  # (NB,2D,2D)

    # full-width gate / projection weights, bf16 (MXU-native, halves resident VMEM)
    wg_b = wg.astype(jnp.bfloat16)                                  # (NB, D, 2D)
    wpr_b = wpr.astype(jnp.bfloat16)                                # (NB, 2D, D)

    # all per-block row vectors packed into one (NB, 8, 2D) f32 slab
    mrow = jnp.concatenate([jnp.swapaxes(mwp, -1, -2),
                            jnp.swapaxes(mwm, -1, -2)], axis=-1)    # (NB, 1, 2D)
    padD = jnp.zeros((NB, 1, D), jnp.float32)
    wvec = jnp.concatenate([
        mrow,                                          # row 0: tropical row-max shifts
        bg,                                            # row 1: gate bias (2D wide)
        jnp.concatenate([bpr, padD], axis=-1),         # row 2: projection bias
        jnp.concatenate([gamma, padD], axis=-1),       # row 3: LN gamma
        jnp.concatenate([beta, padD], axis=-1),        # row 4: LN beta
        jnp.zeros((NB, 3, 2 * D), jnp.float32),        # rows 5-7: pad to 8 sublanes
    ], axis=1)                                                      # (NB, 8, 2D)

    wi_b = wi.astype(jnp.bfloat16)
    # output head stays f32 (last, undamped layer; negligible cost at this size)
    wo_pad = jnp.zeros((D, OUT_PAD), jnp.float32).at[:, :OUTPUT_DIM].set(wo)
    bo_pad = jnp.zeros((1, OUT_PAD), jnp.float32).at[:, :OUTPUT_DIM].set(bo)

    return (wi_b, bi, wtrop, wg_b, wpr_b, wvec, wo_pad, bo_pad)


# ----------------------------------------------------------------------------
# Wrapper
# ----------------------------------------------------------------------------
def _pick_batch_tile(B):
    # Roughly ~2 KiB of live f32 per batch row in the body plus the (TB,128) output
    # double-buffer: a 2048-row tile stays far under v7x's 64 MiB VMEM (and v5e's
    # 16 MiB scoped default once raised), and keeps grid > 1 on huge batches so the
    # "parallel" axis can shard across v7x's two TensorCores.
    cap = 2048
    if B <= cap:
        return B
    t = cap
    while B % t:
        t //= 2
    return max(t, 8)


def interpretable_rune_net(x, kparams, *, batch_tile=None):
    B = x.shape[0]
    if batch_tile is None:
        batch_tile = _pick_batch_tile(B)
    assert B % batch_tile == 0, "batch must be divisible by the batch tile"

    def resident(a):
        # VMEM-resident weights (constant index_map).  pl.Buffered(1) would drop the
        # dead second buffer but is not relied upon here (weights are ~120 KiB total).
        return pl.BlockSpec(a.shape, lambda b, _n=a.ndim: (0,) * _n)

    cp_kwargs = dict(dimension_semantics=("parallel",))
    if batch_tile > 1024:
        cp_kwargs["vmem_limit_bytes"] = 48 << 20   # <= v7x physical VMEM, roomy on v5e/v6e

    # TODO(synk): if invoked repeatedly at tiny B, wall time is pallas_call overhead +
    # per-call weight DMA; keep the prepared weights resident across calls instead.
    out_pad = pl.pallas_call(
        rune_forward_kernel,
        out_shape=jax.ShapeDtypeStruct((B, OUT_PAD), jnp.float32),
        grid=(B // batch_tile,),
        in_specs=[pl.BlockSpec((batch_tile, INPUT_DIM), lambda b: (b, 0))]
                 + [resident(a) for a in kparams],
        out_specs=pl.BlockSpec((batch_tile, OUT_PAD), lambda b: (b, 0)),
        compiler_params=pltpu.CompilerParams(**cp_kwargs),
    )(x, *kparams)
    return out_pad[:, :OUTPUT_DIM]


# ----------------------------------------------------------------------------
# Deterministic parameter initialization (PyTorch-Linear-like uniform ranges)
# ----------------------------------------------------------------------------
def _uniform(key, shape, fan_in):
    bound = 1.0 / jnp.sqrt(jnp.float32(fan_in))
    return jax.random.uniform(key, shape, jnp.float32, -bound, bound)


def init_params(key):
    ks = jax.random.split(key, 16)
    D, IN, OUT, NB = BLOCK_DIM, INPUT_DIM, OUTPUT_DIM, NUM_BLOCKS

    wi = _uniform(ks[0], (IN, D), IN)                     # input projection
    bi = _uniform(ks[1], (1, D), IN)

    wp = jax.random.normal(ks[2], (NB, D, D), jnp.float32) * 0.1   # tropical max-plus
    wm = jax.random.normal(ks[3], (NB, D, D), jnp.float32) * 0.1   # tropical min-plus
    wg = _uniform(ks[4], (NB, D, 2 * D), D)               # gate Linear(D -> 2D)
    bg = _uniform(ks[5], (NB, 1, 2 * D), D)
    wpr = _uniform(ks[6], (NB, 2 * D, D), 2 * D)          # projection Linear(2D -> D)
    bpr = _uniform(ks[7], (NB, 1, D), 2 * D)
    gamma = jnp.ones((NB, 1, D), jnp.float32)             # LayerNorm affine
    beta = jnp.zeros((NB, 1, D), jnp.float32)

    wo = _uniform(ks[8], (D, OUT), D)                     # output head
    bo = _uniform(ks[9], (1, OUT), D)

    return (wi, bi, wp, wm, wg, bg, wpr, bpr, gamma, beta, wo, bo)


# ----------------------------------------------------------------------------
# Pure-JAX reference (same math, raw f32 params) for correctness
# ----------------------------------------------------------------------------
def reference_forward(x, params):
    wi, bi, wp, wm, wg, bg, wpr, bpr, gamma, beta, wo, bo = params
    inv_tau = 1.0 / TAU
    h = x @ wi + bi
    for blk in range(NUM_BLOCKS):
        z_max = h[:, None, :] * inv_tau + wp[blk][None, :, :] * inv_tau   # (B, D, D)
        trop_max = TAU * jax.scipy.special.logsumexp(z_max, axis=-1)
        z_min = -(h[:, None, :] * inv_tau) - wm[blk][None, :, :] * inv_tau
        trop_min = -TAU * jax.scipy.special.logsumexp(z_min, axis=-1)
        feats = jnp.concatenate([trop_max - trop_min, trop_max + trop_min], axis=-1)
        gate = jax.nn.sigmoid(h @ wg[blk] + bg[blk])
        agg = gate * feats
        y = h + (agg @ wpr[blk] + bpr[blk])
        mu = jnp.mean(y, axis=-1, keepdims=True)
        var = jnp.mean(jnp.square(y - mu), axis=-1, keepdims=True)
        h = (y - mu) * jax.lax.rsqrt(var + LN_EPS) * gamma[blk] + beta[blk]
    return h @ wo + bo


if __name__ == "__main__":
    key = jax.random.PRNGKey(0)
    k_x, k_p = jax.random.split(key)
    x = jax.random.normal(k_x, (BATCH, INPUT_DIM), jnp.float32)
    params = init_params(k_p)
    kparams = prepare_params(params)      # one-time weight preprocessing (off hot path)

    out = jax.block_until_ready(interpretable_rune_net(x, kparams))
    ref = jax.block_until_ready(reference_forward(x, params))

    assert out.shape == (BATCH, OUTPUT_DIM)
    assert bool(jnp.all(jnp.isfinite(out)))
    assert bool(jnp.allclose(out, ref, rtol=1e-2, atol=1e-2)), "mismatch vs reference"

    print("KERNEL_OK")
</pallas_src>

<mosaic_0001>
module attributes {stable_mosaic.version = 11 : i64} {
  func.func @rune_forward_kernel(%arg0: i32, %arg1: memref<8x16xf32, #tpu.memory_space<vmem>>, %arg2: memref<16x32xbf16, #tpu.memory_space<vmem>>, %arg3: memref<1x32xf32, #tpu.memory_space<vmem>>, %arg4: memref<2x64x64xbf16, #tpu.memory_space<vmem>>, %arg5: memref<2x32x64xbf16, #tpu.memory_space<vmem>>, %arg6: memref<2x64x32xbf16, #tpu.memory_space<vmem>>, %arg7: memref<2x8x64xf32, #tpu.memory_space<vmem>>, %arg8: memref<32x128xf32, #tpu.memory_space<vmem>>, %arg9: memref<1x128xf32, #tpu.memory_space<vmem>>, %arg10: memref<8x128xf32, #tpu.memory_space<vmem>>) attributes {dimension_semantics = [#tpu.dimension_semantics<parallel>], iteration_bounds = array<i64: 1>, scalar_prefetch = 0 : i64, scratch_operands = 0 : i64, tpu.core_type = #tpu.core_type<tc>, window_params = [{transform_indices = @transform_0, window_bounds = array<i64: 8, 16>}, {pipeline_mode = #tpu.pipeline_mode<synchronous>, transform_indices = @transform_1, window_bounds = array<i64: 16, 32>}, {pipeline_mode = #tpu.pipeline_mode<synchronous>, transform_indices = @transform_2, window_bounds = array<i64: 1, 32>}, {pipeline_mode = #tpu.pipeline_mode<synchronous>, transform_indices = @transform_3, window_bounds = array<i64: 2, 64, 64>}, {pipeline_mode = #tpu.pipeline_mode<synchronous>, transform_indices = @transform_4, window_bounds = array<i64: 2, 32, 64>}, {pipeline_mode = #tpu.pipeline_mode<synchronous>, transform_indices = @transform_5, window_bounds = array<i64: 2, 64, 32>}, {pipeline_mode = #tpu.pipeline_mode<synchronous>, transform_indices = @transform_6, window_bounds = array<i64: 2, 8, 64>}, {pipeline_mode = #tpu.pipeline_mode<synchronous>, transform_indices = @transform_7, window_bounds = array<i64: 32, 128>}, {pipeline_mode = #tpu.pipeline_mode<synchronous>, transform_indices = @transform_8, window_bounds = array<i64: 1, 128>}, {transform_indices = @transform_9, window_bounds = array<i64: 8, 128>}]} {
    %c0 = arith.constant 0 : index
    %c0_0 = arith.constant 0 : index
    %0 = vector.load %arg1[%c0, %c0_0] : memref<8x16xf32, #tpu.memory_space<vmem>>, vector<8x16xf32>
    %1 = arith.truncf %0 : vector<8x16xf32> to vector<8x16xbf16>
    %c0_1 = arith.constant 0 : index
    %c0_2 = arith.constant 0 : index
    %2 = vector.load %arg2[%c0_1, %c0_2] : memref<16x32xbf16, #tpu.memory_space<vmem>>, vector<16x32xbf16>
    %cst = arith.constant dense<0.000000e+00> : vector<8x32xf32>
    %3 = tpu.matmul %1, %2, %cst {dimension_numbers = #tpu.dot_dimension_numbers<[1], [0], [0], [1], [0, 0, 1, 1], [], []>} : vector<8x16xbf16>, vector<16x32xbf16>, vector<8x32xf32> -> vector<8x32xf32>
    %c0_3 = arith.constant 0 : index
    %c0_4 = arith.constant 0 : index
    %4 = vector.load %arg3[%c0_3, %c0_4] : memref<1x32xf32, #tpu.memory_space<vmem>>, vector<1x32xf32>
    %5 = vector.broadcast %4 : vector<1x32xf32> to vector<8x32xf32>
    %6 = arith.addf %3, %5 : vector<8x32xf32>
    %7 = tpu.iota {dimensions = array<i32: 1>} : vector<8x64xi32>
    %c32_i32 = arith.constant 32 : i32
    %8 = vector.broadcast %c32_i32 : i32 to vector<8x64xi32>
    %9 = arith.cmpi slt, %7, %8 : vector<8x64xi32>
    %cst_5 = arith.constant 1.000000e+00 : f32
    %cst_6 = arith.constant -1.000000e+00 : f32
    %10 = vector.broadcast %cst_5 : f32 to vector<8x64xf32>
    %11 = vector.broadcast %cst_6 : f32 to vector<8x64xf32>
    %12 = arith.select %9, %10, %11 : vector<8x64xi1>, vector<8x64xf32>
    %c0_7 = arith.constant 0 : index
    %c0_8 = arith.constant 0 : index
    %c0_9 = arith.constant 0 : index
    %13 = vector.load %arg4[%c0_7, %c0_8, %c0_9] : memref<2x64x64xbf16, #tpu.memory_space<vmem>>, vector<1x64x64xbf16>
    %14 = vector.shape_cast %13 : vector<1x64x64xbf16> to vector<64x64xbf16>
    %c0_10 = arith.constant 0 : index
    %c0_11 = arith.constant 0 : index
    %c0_12 = arith.constant 0 : index
    %15 = vector.load %arg5[%c0_10, %c0_11, %c0_12] : memref<2x32x64xbf16, #tpu.memory_space<vmem>>, vector<1x32x64xbf16>
    %16 = vector.shape_cast %15 : vector<1x32x64xbf16> to vector<32x64xbf16>
    %c0_13 = arith.constant 0 : index
    %c0_14 = arith.constant 0 : index
    %c0_15 = arith.constant 0 : index
    %17 = vector.load %arg6[%c0_13, %c0_14, %c0_15] : memref<2x64x32xbf16, #tpu.memory_space<vmem>>, vector<1x64x32xbf16>
    %18 = vector.shape_cast %17 : vector<1x64x32xbf16> to vector<64x32xbf16>
    %c0_16 = arith.constant 0 : index
    %c0_17 = arith.constant 0 : index
    %c0_18 = arith.constant 0 : index
    %19 = vector.load %arg7[%c0_16, %c0_17, %c0_18] : memref<2x8x64xf32, #tpu.memory_space<vmem>>, vector<1x8x64xf32>
    %20 = vector.shape_cast %19 : vector<1x8x64xf32> to vector<8x64xf32>
    %21 = vector.extract_strided_slice %20 {offsets = [0, 0], sizes = [1, 64], strides = [1, 1]} : vector<8x64xf32> to vector<1x64xf32>
    %22 = vector.extract_strided_slice %20 {offsets = [1, 0], sizes = [1, 64], strides = [1, 1]} : vector<8x64xf32> to vector<1x64xf32>
    %23 = vector.extract_strided_slice %20 {offsets = [2, 0], sizes = [1, 32], strides = [1, 1]} : vector<8x64xf32> to vector<1x32xf32>
    %24 = vector.extract_strided_slice %20 {offsets = [3, 0], sizes = [1, 32], strides = [1, 1]} : vector<8x64xf32> to vector<1x32xf32>
    %25 = vector.extract_strided_slice %20 {offsets = [4, 0], sizes = [1, 32], strides = [1, 1]} : vector<8x64xf32> to vector<1x32xf32>
    %cst_19 = arith.constant 5.000000e+00 : f32
    %26 = vector.broadcast %cst_19 : f32 to vector<8x32xf32>
    %27 = arith.mulf %6, %26 : vector<8x32xf32>
    %cst_20 = arith.constant dense<0xFF800000> : vector<8xf32>
    %28 = vector.multi_reduction <maximumf>, %27, %cst_20 [1] : vector<8x32xf32> to vector<8xf32>
    %29 = vector.shape_cast %28 : vector<8xf32> to vector<8x1xf32>
    %cst_21 = arith.constant dense<0x7F800000> : vector<8xf32>
    %30 = vector.multi_reduction <minimumf>, %27, %cst_21 [1] : vector<8x32xf32> to vector<8xf32>
    %31 = vector.shape_cast %30 : vector<8xf32> to vector<8x1xf32>
    %cst_22 = arith.constant 0.000000e+00 : f32
    %32 = vector.broadcast %cst_22 : f32 to vector<8x32xf32>
    %33 = arith.subf %32, %27 : vector<8x32xf32>
    %34 = tpu.concatenate %27, %33 in 1 : vector<8x32xf32>, vector<8x32xf32> -> vector<8x64xf32>
    %cst_23 = arith.constant 0.000000e+00 : f32
    %35 = vector.broadcast %cst_23 : f32 to vector<8x1xf32>
    %36 = arith.subf %35, %31 : vector<8x1xf32>
    %37 = vector.shape_cast %29 : vector<8x1xf32> to vector<8x1xf32>
    %38 = vector.broadcast %37 : vector<8x1xf32> to vector<8x64xf32>
    %39 = vector.shape_cast %36 : vector<8x1xf32> to vector<8x1xf32>
    %40 = vector.broadcast %39 : vector<8x1xf32> to vector<8x64xf32>
    %41 = arith.select %9, %38, %40 : vector<8x64xi1>, vector<8x64xf32>
    %42 = arith.subf %34, %41 : vector<8x64xf32>
    %43 = math.exp %42 : vector<8x64xf32>
    %44 = arith.truncf %43 : vector<8x64xf32> to vector<8x64xbf16>
    %cst_24 = arith.constant dense<0.000000e+00> : vector<8x64xf32>
    %45 = tpu.matmul %44, %14, %cst_24 {dimension_numbers = #tpu.dot_dimension_numbers<[1], [0], [0], [1], [0, 0, 1, 1], [], []>} : vector<8x64xbf16>, vector<64x64xbf16>, vector<8x64xf32> -> vector<8x64xf32>
    %46 = vector.broadcast %21 : vector<1x64xf32> to vector<8x64xf32>
    %47 = arith.addf %41, %46 : vector<8x64xf32>
    %48 = math.log %45 : vector<8x64xf32>
    %49 = arith.addf %47, %48 : vector<8x64xf32>
    %cst_25 = arith.constant 2.000000e-01 : f32
    %50 = vector.broadcast %cst_25 : f32 to vector<8x64xf32>
    %51 = arith.mulf %50, %49 : vector<8x64xf32>
    %52 = arith.mulf %12, %51 : vector<8x64xf32>
    %53 = vector.extract_strided_slice %52 {offsets = [0, 32], sizes = [8, 32], strides = [1, 1]} : vector<8x64xf32> to vector<8x32xf32>
    %54 = vector.extract_strided_slice %52 {offsets = [0, 0], sizes = [8, 32], strides = [1, 1]} : vector<8x64xf32> to vector<8x32xf32>
    %55 = tpu.concatenate %53, %54 in 1 : vector<8x32xf32>, vector<8x32xf32> -> vector<8x64xf32>
    %56 = arith.mulf %12, %55 : vector<8x64xf32>
    %57 = arith.subf %52, %56 : vector<8x64xf32>
    %58 = arith.truncf %6 : vector<8x32xf32> to vector<8x32xbf16>
    %cst_26 = arith.constant dense<0.000000e+00> : vector<8x64xf32>
    %59 = tpu.matmul %58, %16, %cst_26 {dimension_numbers = #tpu.dot_dimension_numbers<[1], [0], [0], [1], [0, 0, 1, 1], [], []>} : vector<8x32xbf16>, vector<32x64xbf16>, vector<8x64xf32> -> vector<8x64xf32>
    %60 = vector.broadcast %22 : vector<1x64xf32> to vector<8x64xf32>
    %61 = arith.addf %59, %60 : vector<8x64xf32>
    %62 = arith.negf %61 : vector<8x64xf32>
    %63 = math.exp %62 : vector<8x64xf32>
    %cst_27 = arith.constant 1.000000e+00 : f32
    %64 = vector.broadcast %cst_27 : f32 to vector<8x64xf32>
    %65 = arith.addf %64, %63 : vector<8x64xf32>
    %66 = arith.divf %64, %65 : vector<8x64xf32>
    %67 = arith.mulf %66, %57 : vector<8x64xf32>
    %68 = arith.truncf %67 : vector<8x64xf32> to vector<8x64xbf16>
    %cst_28 = arith.constant dense<0.000000e+00> : vector<8x32xf32>
    %69 = tpu.matmul %68, %18, %cst_28 {dimension_numbers = #tpu.dot_dimension_numbers<[1], [0], [0], [1], [0, 0, 1, 1], [], []>} : vector<8x64xbf16>, vector<64x32xbf16>, vector<8x32xf32> -> vector<8x32xf32>
    %70 = vector.broadcast %23 : vector<1x32xf32> to vector<8x32xf32>
    %71 = arith.addf %69, %70 : vector<8x32xf32>
    %72 = arith.addf %6, %71 : vector<8x32xf32>
    %cst_29 = arith.constant dense<0.000000e+00> : vector<8xf32>
    %73 = vector.multi_reduction <add>, %72, %cst_29 [1] : vector<8x32xf32> to vector<8xf32>
    %74 = vector.shape_cast %73 : vector<8xf32> to vector<8x1xf32>
    %75 = arith.mulf %72, %72 : vector<8x32xf32>
    %cst_30 = arith.constant dense<0.000000e+00> : vector<8xf32>
    %76 = vector.multi_reduction <add>, %75, %cst_30 [1] : vector<8x32xf32> to vector<8xf32>
    %77 = vector.shape_cast %76 : vector<8xf32> to vector<8x1xf32>
    %cst_31 = arith.constant 3.125000e-02 : f32
    %78 = vector.broadcast %cst_31 : f32 to vector<8x1xf32>
    %79 = arith.mulf %74, %78 : vector<8x1xf32>
    %cst_32 = arith.constant 3.125000e-02 : f32
    %80 = vector.broadcast %cst_32 : f32 to vector<8x1xf32>
    %81 = arith.mulf %77, %80 : vector<8x1xf32>
    %82 = arith.mulf %79, %79 : vector<8x1xf32>
    %83 = arith.subf %81, %82 : vector<8x1xf32>
    %84 = vector.broadcast %79 : vector<8x1xf32> to vector<8x32xf32>
    %85 = arith.subf %72, %84 : vector<8x32xf32>
    %cst_33 = arith.constant 9.99999974E-6 : f32
    %86 = vector.broadcast %cst_33 : f32 to vector<8x1xf32>
    %87 = arith.addf %83, %86 : vector<8x1xf32>
    %88 = math.rsqrt %87 : vector<8x1xf32>
    %89 = vector.broadcast %88 : vector<8x1xf32> to vector<8x32xf32>
    %90 = arith.mulf %85, %89 : vector<8x32xf32>
    %91 = vector.broadcast %24 : vector<1x32xf32> to vector<8x32xf32>
    %92 = arith.mulf %90, %91 : vector<8x32xf32>
    %93 = vector.broadcast %25 : vector<1x32xf32> to vector<8x32xf32>
    %94 = arith.addf %92, %93 : vector<8x32xf32>
    %c1 = arith.constant 1 : index
    %c0_34 = arith.constant 0 : index
    %c0_35 = arith.constant 0 : index
    %95 = vector.load %arg4[%c1, %c0_34, %c0_35] : memref<2x64x64xbf16, #tpu.memory_space<vmem>>, vector<1x64x64xbf16>
    %96 = vector.shape_cast %95 : vector<1x64x64xbf16> to vector<64x64xbf16>
    %c1_36 = arith.constant 1 : index
    %c0_37 = arith.constant 0 : index
    %c0_38 = arith.constant 0 : index
    %97 = vector.load %arg5[%c1_36, %c0_37, %c0_38] : memref<2x32x64xbf16, #tpu.memory_space<vmem>>, vector<1x32x64xbf16>
    %98 = vector.shape_cast %97 : vector<1x32x64xbf16> to vector<32x64xbf16>
    %c1_39 = arith.constant 1 : index
    %c0_40 = arith.constant 0 : index
    %c0_41 = arith.constant 0 : index
    %99 = vector.load %arg6[%c1_39, %c0_40, %c0_41] : memref<2x64x32xbf16, #tpu.memory_space<vmem>>, vector<1x64x32xbf16>
    %100 = vector.shape_cast %99 : vector<1x64x32xbf16> to vector<64x32xbf16>
    %c1_42 = arith.constant 1 : index
    %c0_43 = arith.constant 0 : index
    %c0_44 = arith.constant 0 : index
    %101 = vector.load %arg7[%c1_42, %c0_43, %c0_44] : memref<2x8x64xf32, #tpu.memory_space<vmem>>, vector<1x8x64xf32>
    %102 = vector.shape_cast %101 : vector<1x8x64xf32> to vector<8x64xf32>
    %103 = vector.extract_strided_slice %102 {offsets = [0, 0], sizes = [1, 64], strides = [1, 1]} : vector<8x64xf32> to vector<1x64xf32>
    %104 = vector.extract_strided_slice %102 {offsets = [1, 0], sizes = [1, 64], strides = [1, 1]} : vector<8x64xf32> to vector<1x64xf32>
    %105 = vector.extract_strided_slice %102 {offsets = [2, 0], sizes = [1, 32], strides = [1, 1]} : vector<8x64xf32> to vector<1x32xf32>
    %106 = vector.extract_strided_slice %102 {offsets = [3, 0], sizes = [1, 32], strides = [1, 1]} : vector<8x64xf32> to vector<1x32xf32>
    %107 = vector.extract_strided_slice %102 {offsets = [4, 0], sizes = [1, 32], strides = [1, 1]} : vector<8x64xf32> to vector<1x32xf32>
    %cst_45 = arith.constant 5.000000e+00 : f32
    %108 = vector.broadcast %cst_45 : f32 to vector<8x32xf32>
    %109 = arith.mulf %94, %108 : vector<8x32xf32>
    %cst_46 = arith.constant dense<0xFF800000> : vector<8xf32>
    %110 = vector.multi_reduction <maximumf>, %109, %cst_46 [1] : vector<8x32xf32> to vector<8xf32>
    %111 = vector.shape_cast %110 : vector<8xf32> to vector<8x1xf32>
    %cst_47 = arith.constant dense<0x7F800000> : vector<8xf32>
    %112 = vector.multi_reduction <minimumf>, %109, %cst_47 [1] : vector<8x32xf32> to vector<8xf32>
    %113 = vector.shape_cast %112 : vector<8xf32> to vector<8x1xf32>
    %cst_48 = arith.constant 0.000000e+00 : f32
    %114 = vector.broadcast %cst_48 : f32 to vector<8x32xf32>
    %115 = arith.subf %114, %109 : vector<8x32xf32>
    %116 = tpu.concatenate %109, %115 in 1 : vector<8x32xf32>, vector<8x32xf32> -> vector<8x64xf32>
    %cst_49 = arith.constant 0.000000e+00 : f32
    %117 = vector.broadcast %cst_49 : f32 to vector<8x1xf32>
    %118 = arith.subf %117, %113 : vector<8x1xf32>
    %119 = vector.shape_cast %111 : vector<8x1xf32> to vector<8x1xf32>
    %120 = vector.broadcast %119 : vector<8x1xf32> to vector<8x64xf32>
    %121 = vector.shape_cast %118 : vector<8x1xf32> to vector<8x1xf32>
    %122 = vector.broadcast %121 : vector<8x1xf32> to vector<8x64xf32>
    %123 = arith.select %9, %120, %122 : vector<8x64xi1>, vector<8x64xf32>
    %124 = arith.subf %116, %123 : vector<8x64xf32>
    %125 = math.exp %124 : vector<8x64xf32>
    %126 = arith.truncf %125 : vector<8x64xf32> to vector<8x64xbf16>
    %cst_50 = arith.constant dense<0.000000e+00> : vector<8x64xf32>
    %127 = tpu.matmul %126, %96, %cst_50 {dimension_numbers = #tpu.dot_dimension_numbers<[1], [0], [0], [1], [0, 0, 1, 1], [], []>} : vector<8x64xbf16>, vector<64x64xbf16>, vector<8x64xf32> -> vector<8x64xf32>
    %128 = vector.broadcast %103 : vector<1x64xf32> to vector<8x64xf32>
    %129 = arith.addf %123, %128 : vector<8x64xf32>
    %130 = math.log %127 : vector<8x64xf32>
    %131 = arith.addf %129, %130 : vector<8x64xf32>
    %cst_51 = arith.constant 2.000000e-01 : f32
    %132 = vector.broadcast %cst_51 : f32 to vector<8x64xf32>
    %133 = arith.mulf %132, %131 : vector<8x64xf32>
    %134 = arith.mulf %12, %133 : vector<8x64xf32>
    %135 = vector.extract_strided_slice %134 {offsets = [0, 32], sizes = [8, 32], strides = [1, 1]} : vector<8x64xf32> to vector<8x32xf32>
    %136 = vector.extract_strided_slice %134 {offsets = [0, 0], sizes = [8, 32], strides = [1, 1]} : vector<8x64xf32> to vector<8x32xf32>
    %137 = tpu.concatenate %135, %136 in 1 : vector<8x32xf32>, vector<8x32xf32> -> vector<8x64xf32>
    %138 = arith.mulf %12, %137 : vector<8x64xf32>
    %139 = arith.subf %134, %138 : vector<8x64xf32>
    %140 = arith.truncf %94 : vector<8x32xf32> to vector<8x32xbf16>
    %cst_52 = arith.constant dense<0.000000e+00> : vector<8x64xf32>
    %141 = tpu.matmul %140, %98, %cst_52 {dimension_numbers = #tpu.dot_dimension_numbers<[1], [0], [0], [1], [0, 0, 1, 1], [], []>} : vector<8x32xbf16>, vector<32x64xbf16>, vector<8x64xf32> -> vector<8x64xf32>
    %142 = vector.broadcast %104 : vector<1x64xf32> to vector<8x64xf32>
    %143 = arith.addf %141, %142 : vector<8x64xf32>
    %144 = arith.negf %143 : vector<8x64xf32>
    %145 = math.exp %144 : vector<8x64xf32>
    %cst_53 = arith.constant 1.000000e+00 : f32
    %146 = vector.broadcast %cst_53 : f32 to vector<8x64xf32>
    %147 = arith.addf %146, %145 : vector<8x64xf32>
    %148 = arith.divf %146, %147 : vector<8x64xf32>
    %149 = arith.mulf %148, %139 : vector<8x64xf32>
    %150 = arith.truncf %149 : vector<8x64xf32> to vector<8x64xbf16>
    %cst_54 = arith.constant dense<0.000000e+00> : vector<8x32xf32>
    %151 = tpu.matmul %150, %100, %cst_54 {dimension_numbers = #tpu.dot_dimension_numbers<[1], [0], [0], [1], [0, 0, 1, 1], [], []>} : vector<8x64xbf16>, vector<64x32xbf16>, vector<8x32xf32> -> vector<8x32xf32>
    %152 = vector.broadcast %105 : vector<1x32xf32> to vector<8x32xf32>
    %153 = arith.addf %151, %152 : vector<8x32xf32>
    %154 = arith.addf %94, %153 : vector<8x32xf32>
    %cst_55 = arith.constant dense<0.000000e+00> : vector<8xf32>
    %155 = vector.multi_reduction <add>, %154, %cst_55 [1] : vector<8x32xf32> to vector<8xf32>
    %156 = vector.shape_cast %155 : vector<8xf32> to vector<8x1xf32>
    %157 = arith.mulf %154, %154 : vector<8x32xf32>
    %cst_56 = arith.constant dense<0.000000e+00> : vector<8xf32>
    %158 = vector.multi_reduction <add>, %157, %cst_56 [1] : vector<8x32xf32> to vector<8xf32>
    %159 = vector.shape_cast %158 : vector<8xf32> to vector<8x1xf32>
    %cst_57 = arith.constant 3.125000e-02 : f32
    %160 = vector.broadcast %cst_57 : f32 to vector<8x1xf32>
    %161 = arith.mulf %156, %160 : vector<8x1xf32>
    %cst_58 = arith.constant 3.125000e-02 : f32
    %162 = vector.broadcast %cst_58 : f32 to vector<8x1xf32>
    %163 = arith.mulf %159, %162 : vector<8x1xf32>
    %164 = arith.mulf %161, %161 : vector<8x1xf32>
    %165 = arith.subf %163, %164 : vector<8x1xf32>
    %166 = vector.broadcast %161 : vector<8x1xf32> to vector<8x32xf32>
    %167 = arith.subf %154, %166 : vector<8x32xf32>
    %cst_59 = arith.constant 9.99999974E-6 : f32
    %168 = vector.broadcast %cst_59 : f32 to vector<8x1xf32>
    %169 = arith.addf %165, %168 : vector<8x1xf32>
    %170 = math.rsqrt %169 : vector<8x1xf32>
    %171 = vector.broadcast %170 : vector<8x1xf32> to vector<8x32xf32>
    %172 = arith.mulf %167, %171 : vector<8x32xf32>
    %173 = vector.broadcast %106 : vector<1x32xf32> to vector<8x32xf32>
    %174 = arith.mulf %172, %173 : vector<8x32xf32>
    %175 = vector.broadcast %107 : vector<1x32xf32> to vector<8x32xf32>
    %176 = arith.addf %174, %175 : vector<8x32xf32>
    %c0_60 = arith.constant 0 : index
    %c0_61 = arith.constant 0 : index
    %177 = vector.load %arg8[%c0_60, %c0_61] : memref<32x128xf32, #tpu.memory_space<vmem>>, vector<32x128xf32>
    %cst_62 = arith.constant dense<0.000000e+00> : vector<8x128xf32>
    %178 = tpu.matmul %176, %177, %cst_62 {dimension_numbers = #tpu.dot_dimension_numbers<[1], [0], [0], [1], [0, 0, 1, 1], [], []>} : vector<8x32xf32>, vector<32x128xf32>, vector<8x128xf32> -> vector<8x128xf32>
    %c0_63 = arith.constant 0 : index
    %c0_64 = arith.constant 0 : index
    %179 = vector.load %arg9[%c0_63, %c0_64] : memref<1x128xf32, #tpu.memory_space<vmem>>, vector<1x128xf32>
    %180 = vector.broadcast %179 : vector<1x128xf32> to vector<8x128xf32>
    %181 = arith.addf %178, %180 : vector<8x128xf32>
    %c0_65 = arith.constant 0 : index
    %c0_66 = arith.constant 0 : index
    %182 = vector.load %arg10[%c0_65, %c0_66] : memref<8x128xf32, #tpu.memory_space<vmem>>, vector<8x128xf32>
    tpu.vector_store %arg10[%c0_65, %c0_66], %181 {strides = array<i32>} : memref<8x128xf32, #tpu.memory_space<vmem>>, vector<8x128xf32>,
    return
  }
  func.func @transform_0(%arg0: i32) -> (i32, i32) {
    %c0_i32 = arith.constant 0 : i32
    %c0_i32_0 = arith.constant 0 : i32
    return %arg0, %c0_i32 : i32, i32
  }
  func.func @transform_1(%arg0: i32) -> (i32, i32) {
    %c0_i32 = arith.constant 0 : i32
    %c0_i32_0 = arith.constant 0 : i32
    %c0_i32_1 = arith.constant 0 : i32
    return %c0_i32, %c0_i32_0 : i32, i32
  }
  func.func @transform_2(%arg0: i32) -> (i32, i32) {
    %c0_i32 = arith.constant 0 : i32
    %c0_i32_0 = arith.constant 0 : i32
    %c0_i32_1 = arith.constant 0 : i32
    return %c0_i32, %c0_i32_0 : i32, i32
  }
  func.func @transform_3(%arg0: i32) -> (i32, i32, i32) {
    %c0_i32 = arith.constant 0 : i32
    %c0_i32_0 = arith.constant 0 : i32
    %c0_i32_1 = arith.constant 0 : i32
    %c0_i32_2 = arith.constant 0 : i32
    return %c0_i32, %c0_i32_0, %c0_i32_1 : i32, i32, i32
  }
  func.func @transform_4(%arg0: i32) -> (i32, i32, i32) {
    %c0_i32 = arith.constant 0 : i32
    %c0_i32_0 = arith.constant 0 : i32
    %c0_i32_1 = arith.constant 0 : i32
    %c0_i32_2 = arith.constant 0 : i32
    return %c0_i32, %c0_i32_0, %c0_i32_1 : i32, i32, i32
  }
  func.func @transform_5(%arg0: i32) -> (i32, i32, i32) {
    %c0_i32 = arith.constant 0 : i32
    %c0_i32_0 = arith.constant 0 : i32
    %c0_i32_1 = arith.constant 0 : i32
    %c0_i32_2 = arith.constant 0 : i32
    return %c0_i32, %c0_i32_0, %c0_i32_1 : i32, i32, i32
  }
  func.func @transform_6(%arg0: i32) -> (i32, i32, i32) {
    %c0_i32 = arith.constant 0 : i32
    %c0_i32_0 = arith.constant 0 : i32
    %c0_i32_1 = arith.constant 0 : i32
    %c0_i32_2 = arith.constant 0 : i32
    return %c0_i32, %c0_i32_0, %c0_i32_1 : i32, i32, i32
  }
  func.func @transform_7(%arg0: i32) -> (i32, i32) {
    %c0_i32 = arith.constant 0 : i32
    %c0_i32_0 = arith.constant 0 : i32
    %c0_i32_1 = arith.constant 0 : i32
    return %c0_i32, %c0_i32_0 : i32, i32
  }
  func.func @transform_8(%arg0: i32) -> (i32, i32) {
    %c0_i32 = arith.constant 0 : i32
    %c0_i32_0 = arith.constant 0 : i32
    %c0_i32_1 = arith.constant 0 : i32
    return %c0_i32, %c0_i32_0 : i32, i32
  }
  func.func @transform_9(%arg0: i32) -> (i32, i32) {
    %c0_i32 = arith.constant 0 : i32
    %c0_i32_0 = arith.constant 0 : i32
    return %arg0, %c0_i32 : i32, i32
  }
}

</mosaic_0001>

<bundles_post_ra>
// kernel: tpu_custom_call.1
= control target key start
LH: loop header
LB: loop body
LE: loop exit
PB: predicated region body
PF: predicated region fallthrough
CT: control target
= control target key end

     0   :  { %14 = vsyncpa [#allocation3], 0  ;;  %s1466_s0 = inlined_call_operand.hbm [shape: f32[8,16], index: 0, kind: input, shape index: {}]   ;;  %s1467_s1 = inlined_call_operand.hbm [shape: bf16[16,32], index: 1, kind: input, shape index: {}]   ;;  %s1468_s2 = inlined_call_operand.vmem [shape: f32[1,32], index: 2, kind: input, shape index: {}]   ;;  %s1469_s3 = inlined_call_operand.vmem [shape: bf16[2,64,64], index: 3, kind: input, shape index: {}]   ;;  %s1470_s4 = inlined_call_operand.vmem [shape: bf16[2,32,64], index: 4, kind: input, shape index: {}]   ;;  %s1471_s5 = inlined_call_operand.vmem [shape: bf16[2,64,32], index: 5, kind: input, shape index: {}]   ;;  %s1472_s6 = inlined_call_operand.vmem [shape: f32[2,8,64], index: 6, kind: input, shape index: {}]   ;;  %s1473_s7 = inlined_call_operand.hbm [shape: f32[32,128], index: 7, kind: input, shape index: {}]   ;;  %s1474_s8 = inlined_call_operand.vmem [shape: f32[1,128], index: 8, kind: input, shape index: {}]   ;;  %s1475_s9 = inlined_call_operand.hbm [shape: f32[8,128], index: 9, kind: output, shape index: {}]  }
   0x1   :  { %15 = vsyncpa [#allocation6], 0 }
   0x2   :  { %16 = vsyncpa [#allocation4], 0  ;;  %s1152_s30 = smov [#allocation5]   ;;  %s1058_s13 = scalar_lea.hbm %s1467_s1, 128 }
   0x3   :  { %s32_s10 = sshll.u32 %s1152_s30, 4  ;;  %p1059_p0 = scmp.ne.s32.totalorder %s1467_s1, %s1058_s13  ;;  %s33_s10 = int_to_ptr.vmem [resolvable:$true] %s32_s10 }
   0x4   :  { %p1062_p1 = scmp.lt.u32.totalorder %s1058_s13, %s1467_s1 }
   0x6   :  { %p1064_p2 = pnand %p1062_p1, %p1059_p0 }
   0x8   :  { %1067 = shalt.err (!%p1064_p2)
}
   0x9   :  { %s1068_s18 = scalar_lea.vmem %s33_s10, 128  ;;  %p1073_p4 = scmp.lt.s32.totalorder %s33_s10, %s33_s10 }
   0xa   :  { %p1069_p3 = scmp.ne.s32.totalorder %s33_s10, %s1068_s18  ;;  %p1074_p5 = scmp.lt.s32.totalorder %s1068_s18, %s1068_s18 }
   0xc   :  { %p1075_p6 = por %p1074_p5, %p1073_p4 }
   0xe   :  { %p1076_p7 = pnand %p1075_p6, %p1069_p3 }
  0x10   :  { %1079 = shalt.err (!%p1076_p7)
}
  0x11   :  { %s1153_s19 = smov 64   ;;  %s1154_s20 = smov 4  }
  0x12   :  { %38 = dma.hbm_to_vmem [thread:$0]  %s1467_s1, 128, %s33_s10, [#allocation6], %s1153_s19, %s1153_s19, %s1154_s20  }
  0x13   :  { %s1155_s23 = smov [#allocation2]   ;;  %s1156_s25 = smov [#allocation7]  }
  0x14   :  { %s23_s24 = sshll.u32 %s1155_s23, 4  ;;  %s54_s26 = sshll.u32 %s1156_s25, 4  ;;  %s24_s24 = int_to_ptr.vmem [resolvable:$true] %s23_s24  ;;  %s55_s26 = int_to_ptr.vmem [resolvable:$true] %s54_s26 }
  0x15   :  { %s1080_s29 = scalar_lea.hbm %s1466_s0, 128 }
  0x16   :  { %p1081_p8 = scmp.ne.s32.totalorder %s1466_s0, %s1080_s29  ;;  %p1084_p9 = scmp.lt.u32.totalorder %s1080_s29, %s1466_s0 }
  0x18   :  { %p1086_p10 = pnand %p1084_p9, %p1081_p8 }
  0x1a   :  { %1089 = shalt.err (!%p1086_p10)
}
  0x1b   :  { %s1090_s1 = scalar_lea.vmem %s24_s24, 128  ;;  %p1095_p12 = scmp.lt.s32.totalorder %s24_s24, %s24_s24 }
  0x1c   :  { %p1091_p11 = scmp.ne.s32.totalorder %s24_s24, %s1090_s1  ;;  %p1096_p13 = scmp.lt.s32.totalorder %s1090_s1, %s1090_s1 }
  0x1e   :  { %p1097_p0 = por %p1096_p13, %p1095_p12 }
  0x20   :  { %p1098_p1 = pnand %p1097_p0, %p1091_p11 }
  0x22   :  { %1101 = shalt.err (!%p1098_p1)
}
  0x23   :  { %26 = dma.hbm_to_vmem [thread:$0]  %s1466_s0, 128, %s24_s24, [#allocation3]  }
  0x24   :  { %s1102_s17 = scalar_lea.hbm %s1473_s7, 512 }
  0x25   :  { %p1103_p2 = scmp.ne.s32.totalorder %s1473_s7, %s1102_s17  ;;  %p1106_p3 = scmp.lt.u32.totalorder %s1102_s17, %s1473_s7 }
  0x27   :  { %p1108_p4 = pnand %p1106_p3, %p1103_p2 }
  0x29   :  { %1111 = shalt.err (!%p1108_p4)
}
  0x2a   :  { %s1112_s22 = scalar_lea.vmem %s55_s26, 512  ;;  %p1117_p6 = scmp.lt.s32.totalorder %s55_s26, %s55_s26 }
  0x2b   :  { %p1113_p5 = scmp.ne.s32.totalorder %s55_s26, %s1112_s22  ;;  %p1118_p7 = scmp.lt.s32.totalorder %s1112_s22, %s1112_s22 }
  0x2d   :  { %p1119_p8 = por %p1118_p7, %p1117_p6 }
  0x2f   :  { %p1120_p9 = pnand %p1119_p8, %p1113_p5 }
  0x31   :  { %1123 = shalt.err (!%p1120_p9)
}
  0x32   :  { %s1157_s0 = smov 128   ;;  %s1158_s23 = smov 8  }
  0x33   :  { %60 = dma.hbm_to_vmem [thread:$0]  %s1473_s7, 512, %s55_s26, [#allocation6], %s1157_s0, %s1157_s0, %s1158_s23  }
  0x34   :  { %1146 = dma.done.wait [#allocation3], 128  }
  0x35   :  { %1147 = vsyncadd [#allocation3], 4294967168 }
  0x36   :  { %1148 = dma.done.wait [#allocation6], 640  }
  0x37   :  { %1149 = vsyncadd [#allocation6], 4294966656  ;;  %v1159_v0 = vmov 0.0   ;;  %vm1160_vm0 = vmmov 0   ;;  %v1017_v1 = vld [vmem:[#allocation5] sm:$0xff]   ;;  %v73_v2 = vld [vmem:[#allocation2] sm:$0xff]  ;;  %v134_v21 = vlaneseq }
  0x38   :  { %916 = vmatprep.subr.bf16.mxu0 %v1159_v0  ;;  %918 = vmatprep.mubr.msk.bf16.mxu0 %vm1160_vm0, %v1159_v0  ;;  %v74_v3 = vpack.c.bf16 %v73_v2, %v73_v2  ;;  %vm90_vm1 = vcmask 130048   ;;  %v1018_v4 = vld [vmem:[%s1470_s4] sm:$0xff]   ;;  %v1019_v5 = vld [vmem:[%s1470_s4 + $0x8] sm:$0xff]   ;;  %vm160_vm2 = vcmask 261120   ;;  %v1022_v19 = vld [vmem:[%s1469_s3 + $0x10] sm:$0xff]   ;;  %vm203_vm4 = vcmask 523264  }
  0x39   :  { %922 = vmatprep.subr.bf16.mxu1 %v1159_v0  ;;  %930 = vmatprep.mubr.msk.bf16.mxu1 %vm1160_vm0, %v1159_v0  ;;  %v829_v6 = vld [vmem:[%s1468_s2] ss:$0 sm:$0xff]  ;;  %s1161_s2 = smov 32   ;;  %v1021_v18 = vld [vmem:[%s1469_s3 + $0x8] sm:$0xff]   ;;  %v1023_v20 = vld [vmem:[%s1469_s3 + $0x18] sm:$0xff]   ;;  %v1299_v22 = vand.u32 127, %v134_v21 }
  0x3a   :  { %917 = vmatpush3.bf16.msra.mxu0 %v1017_v1  ;;  %v1020_v17 = vld [vmem:[%s1469_s3] sm:$0xff]   ;;  %v1025_v38 = vld [vmem:[%s1471_s5 + $0x8] sm:$0xff]   ;;  %v1316_v39 = vshrl.u32 %v134_v21, 7  ;;  %v1026_v46 = vld [vmem:[%s1471_s5 + $0x10] sm:$0xff]   ;;  %v1162_v53 = vmov -1.0   ;;  %s1163_s7 = smov 96  }
  0x3b   :  { %934 = vmatprep.subr.bf16.mxu0 %v1159_v0  ;;  %923 = vmatpush3.bf16.msra.mxu1 %v1020_v17  ;;  %vm136_vm3 = vcmp.lt.s32.totalorder %v1299_v22, 32  ;;  %v1024_v37 = vld [vmem:[%s1471_s5] sm:$0xff]   ;;  %v1027_v49 = vld [vmem:[%s1471_s5 + $0x18] sm:$0xff]  }
  0x3c   :  { %924 = vmatprep.subr.bf16.mxu1 %v1159_v0  ;;  %v249_v44 = vsub.s32 0, %v1316_v39  ;;  %v1322_v45 = vld [vmem:[%s1472_s6] sm:$0xff]  ;;  %v1337_v54 = vsel %vm136_vm3, 1.0, %v1162_v53  ;;  %v270_v57 = vsub.s32 1, %v1316_v39  ;;  %v1029_v21 = vld [vmem:[%s1470_s4 + $0x18] sm:$0xff]  }
  0x3d   :  { %919 = vmatmul.mubr.msk.bf16.vlgmr.msra.gmra.mrb[0].mxu0 %vm90_vm1, %v74_v3  ;;  %v1034_v22 = vld [vmem:[%s1471_s5 + $0x20] sm:$0xff]  }
  0x3e   :  { %935 = vmatpush3.bf16.msra.mxu0 %v1018_v4  ;;  %938 = vmatprep.mubr.msk.bf16.mxu0 %vm1160_vm0, %v1159_v0  ;;  %v250_v47 = vrot.slane %v1322_v45, %v249_v44  ;;  %v271_v58 = vrot.slane %v1322_v45, %v270_v57 }
  0x3f   :  { %936 = vmatprep.subr.bf16.mxu0 %v1159_v0  ;;  %925 = vmatpush3.bf16.msra.mxu1 %v1021_v18 }
  0x40   :  { %926 = vmatprep.subr.bf16.mxu1 %v1159_v0 }
  0x42   :  { %937 = vmatpush3.bf16.msra.mxu0 %v1019_v5 }
  0x43   :  { %942 = vmatprep.subr.bf16.mxu0 %v1159_v0  ;;  %927 = vmatpush3.bf16.msra.mxu1 %v1022_v19 }
  0x44   :  { %928 = vmatprep.subr.bf16.mxu1 %v1159_v0 }
  0x47   :  { %929 = vmatpush3.bf16.msra.mxu1 %v1023_v20  ;;  %v1028_v20 = vld [vmem:[%s1470_s4 + $0x10] sm:$0xff]  }
  0x48   :  { %954 = vmatprep.subr.bf16.mxu1 %v1159_v0 }
 0x110   :  { %v128_v7 = vpop.f32.mrb[0].mxu0 }
 0x111   :  { %v1272_v8 = vadd.f32 %v829_v6, %v128_v7  ;;  %v920_v9 = vpop.f32.mrb[1].mxu0 }
 0x112   :  { %v131_v10 = vpop.f32.mrb[2].mxu0  ;;  %v337_v9 = vsub.s32 2, %v1316_v39 }
 0x113   :  { %v159_v11 = vmul.f32 5.0, %v1272_v8  ;;  %v267_v12 = vpack.c.bf16 %v1272_v8, %v1272_v8  ;;  %v921_v13 = vpop.f32.mrb[3].mxu0 }
 0x114   :  { %v338_v10 = vrot.slane %v1322_v45, %v337_v9 }
 0x115   :  { %939 = vmatmul.mubr.msk.bf16.vlgmr.msra.gmra.mrb[4].mxu0 %vm160_vm2, %v267_v12  ;;  %v164_v14 = vsel %vm160_vm2, %v159_v11, inf  ;;  %v167_v15 = vsub.f32 0.0, %v159_v11  ;;  %v161_v16 = vsel %vm160_vm2, %v159_v11, -inf }
 0x116   :  { %165 = vmin.xlane.f32.xlu0 %v164_v14  ;;  %950 = vmatprep.mubr.msk.bf16.mxu0 %vm1160_vm0, %v1159_v0 }
 0x117   :  { %169 = vrot.lane.b32.xlu1 %v167_v15, %s1161_s2  ;;  %943 = vmatpush3.bf16.msra.mxu0 %v1024_v37 }
 0x118   :  { %944 = vmatprep.subr.bf16.mxu0 %v1159_v0 }
 0x11a   :  { %162 = vmax.xlane.f32.xlu0 %v161_v16 }
 0x11b   :  { %945 = vmatpush3.bf16.msra.mxu0 %v1025_v38 }
 0x11c   :  { %946 = vmatprep.subr.bf16.mxu0 %v1159_v0 }
 0x11f   :  { %947 = vmatpush3.bf16.msra.mxu0 %v1026_v46  ;;  %v1031_v46 = vld [vmem:[%s1469_s3 + $0x28] sm:$0xff]  }
 0x120   :  { %948 = vmatprep.subr.bf16.mxu0 %v1159_v0 }
 0x123   :  { %949 = vmatpush3.bf16.msra.mxu0 %v1027_v49 }
 0x124   :  { %966 = vmatprep.subr.bf16.mxu0 %v1159_v0 }
 0x189   :  { %v170_v24 = vpop.permute.xlu1 %169 }
 0x18a   :  { %v172_v27 = vsel %vm160_vm2, %v159_v11, %v170_v24 }
 0x1a3   :  { %v166_v23 = vpop.xlane.xlu0 %165 }
 0x1a4   :  { %v173_v25 = vsub.f32 0.0, %v166_v23 }
 0x1a7   :  { %v163_v26 = vpop.xlane.xlu0 %162 }
 0x1a8   :  { %v174_v28 = vsel %vm136_vm3, %v163_v26, %v173_v25 }
 0x1a9   :  { %v175_v29 = vsub.f32 %v172_v27, %v174_v28  ;;  %v251_v50 = vadd.f32 %v250_v47, %v174_v28  ;;  %v1032_v47 = vld [vmem:[%s1469_s3 + $0x30] sm:$0xff]  }
 0x1ab   :  { %v176_v30 = vmul.f32 1.442695, %v175_v29  ;;  %v424_v29 = vsub.s32 3, %v1316_v39 }
 0x1ad   :  { %1038 = vpow2.f32 %v176_v30  ;;  %v429_v30 = vsub.s32 4, %v1316_v39 }
 0x1b7   :  { %v1039_v31 = vpop.eup %1038 }
 0x1b8   :  { %v178_v32 = vpack.c.bf16 %v1039_v31, %v1039_v31  ;;  %v425_v31 = vrot.slane %v1322_v45, %v424_v29 }
 0x1ba   :  { %931 = vmatmul.mubr.msk.bf16.vlgmr.msra.gmra.mrb[0].mxu1 %vm203_vm4, %v178_v32 }
 0x1bb   :  { %962 = vmatprep.mubr.msk.bf16.mxu1 %vm1160_vm0, %v1159_v0 }
 0x1e8   :  { %v321_v33 = vpop.f32.mrb[4].mxu0 }
 0x1e9   :  { %v940_v34 = vpop.f32.mrb[5].mxu0  ;;  %v322_v59 = vadd.f32 %v321_v33, %v271_v58 }
 0x1ea   :  { %v324_v35 = vpop.f32.mrb[6].mxu0  ;;  %v430_v34 = vrot.slane %v1322_v45, %v429_v30  ;;  %v1030_v45 = vld [vmem:[%s1469_s3 + $0x20] sm:$0xff]  }
 0x1eb   :  { %v941_v36 = vpop.f32.mrb[7].mxu0  ;;  %v840_v60 = vmul.f32 -1.442695, %v322_v59  ;;  %955 = vmatpush3.bf16.msra.mxu1 %v1030_v45 }
 0x1ec   :  { %956 = vmatprep.subr.bf16.mxu1 %v1159_v0 }
 0x1ef   :  { %957 = vmatpush3.bf16.msra.mxu1 %v1031_v46  ;;  %v1164_v46 = vmov 0.0|0.0  }
 0x1f0   :  { %958 = vmatprep.subr.bf16.mxu1 %v1159_v0 }
 0x1f3   :  { %959 = vmatpush3.bf16.msra.mxu1 %v1032_v47  ;;  %v731_v47 = vld [vmem:[#allocation7 + $0x18] sm:$0xff] }
 0x1f4   :  { %960 = vmatprep.subr.bf16.mxu1 %v1159_v0 }
 0x28d   :  { %v241_v40 = vpop.f32.mrb[0].mxu1 }
 0x28e   :  { %1040 = vlog2.f32 %v241_v40  ;;  %v932_v41 = vpop.f32.mrb[1].mxu1 }
 0x28f   :  { %v244_v42 = vpop.f32.mrb[2].mxu1  ;;  %1042 = vpow2.f32 %v840_v60 }
 0x290   :  { %v933_v43 = vpop.f32.mrb[3].mxu1 }
 0x298   :  { %v1041_v48 = vpop.eup %1040 }
 0x299   :  { %v253_v51 = vmul.f32 0.6931472, %v1041_v48  ;;  %v1043_v61 = vpop.eup %1042  ;;  %v1033_v48 = vld [vmem:[%s1469_s3 + $0x38] sm:$0xff]  }
 0x29a   :  { %v330_v62 = vadd.f32 1.0, %v1043_v61  ;;  %961 = vmatpush3.bf16.msra.mxu1 %v1033_v48 }
 0x29b   :  { %v254_v52 = vadd.f32 %v253_v51, %v251_v50  ;;  %974 = vmatprep.subr.bf16.mxu1 %v1159_v0 }
 0x29c   :  { %1044 = vrcp.f32 %v330_v62 }
 0x29d   :  { %v255_v55 = vmul.f32 0.2, %v254_v52 }
 0x29f   :  { %v256_v56 = vmul.f32 %v255_v55, %v1337_v54 }
 0x2a1   :  { %261 = vrot.lane.b32.xlu0 %v256_v56, %s1161_s2  ;;  %258 = vrot.lane.b32.xlu1 %v256_v56, %s1163_s7 }
 0x2a6   :  { %v1045_v5 = vpop.eup %1044 }
 0x313   :  { %v262_v63 = vpop.permute.xlu0 %261  ;;  %v259_v1 = vpop.permute.xlu1 %258 }
 0x314   :  { %v264_v2 = vsel %vm160_vm2, %v259_v1, %v262_v63 }
 0x315   :  { %v265_v3 = vmul.f32 %v264_v2, %v1337_v54  ;;  %v1035_v2 = vld [vmem:[%s1471_s5 + $0x28] sm:$0xff]  }
 0x317   :  { %v266_v4 = vsub.f32 %v256_v56, %v265_v3 }
 0x319   :  { %v333_v6 = vmul.f32 %v1045_v5, %v266_v4 }
 0x31b   :  { %v334_v7 = vpack.c.bf16 %v333_v6, %v333_v6 }
 0x31d   :  { %951 = vmatmul.mubr.msk.bf16.vlgmr.msra.gmra.mrb[8].mxu0 %vm203_vm4, %v334_v7  ;;  %v1417_v7 = vld [vmem:[%s1472_s6 + $0x8] sm:$0xff] }
 0x31e   :  { %970 = vmatprep.mubr.msk.bf16.mxu0 %vm1160_vm0, %v1159_v0  ;;  %967 = vmatpush3.bf16.msra.mxu0 %v1028_v20 }
 0x31f   :  { %968 = vmatprep.subr.bf16.mxu0 %v1159_v0 }
 0x322   :  { %969 = vmatpush3.bf16.msra.mxu0 %v1029_v21 }
 0x323   :  { %997 = vmatprep.subr.bf16.mxu0 %v1164_v46 }
 0x3f0   :  { %v400_v11 = vpop.f32.mrb[8].mxu0 }
 0x3f1   :  { %v401_v12 = vadd.f32 %v400_v11, %v338_v10  ;;  %v952_v13 = vpop.f32.mrb[9].mxu0  ;;  %v1036_v10 = vld [vmem:[%s1471_s5 + $0x30] sm:$0xff]   ;;  %v546_v11 = vrot.slane %v1417_v7, %v249_v44 }
 0x3f2   :  { %v403_v14 = vpop.f32.mrb[10].mxu0  ;;  %v1037_v13 = vld [vmem:[%s1471_s5 + $0x38] sm:$0xff]  }
 0x3f3   :  { %v406_v15 = vadd.f32 %v401_v12, %v1272_v8  ;;  %v953_v16 = vpop.f32.mrb[11].mxu0 }
 0x3f5   :  { %v407_v17 = vsel %vm160_vm2, %v406_v15, 0.0  ;;  %v410_v18 = vmul.f32 %v406_v15, %v406_v15 }
 0x3f6   :  { %408 = vadd.xlane.f32.xlu1 %v407_v17 }
 0x3f7   :  { %v411_v19 = vsel %vm160_vm2, %v410_v18, 0.0 }
 0x3f8   :  { %412 = vadd.xlane.f32.xlu0 %v411_v19 }
 0x483   :  { %v409_v8 = vpop.xlane.xlu1 %408 }
 0x484   :  { %v414_v23 = vmul.f32 0.03125, %v409_v8 }
 0x485   :  { %v413_v24 = vpop.xlane.xlu0 %412 }
 0x486   :  { %v416_v25 = vmul.f32 %v414_v23, %v414_v23  ;;  %v415_v26 = vmul.f32 0.03125, %v413_v24  ;;  %v418_v32 = vsub.f32 %v406_v15, %v414_v23 }
 0x488   :  { %v417_v27 = vsub.f32 %v415_v26, %v416_v25 }
 0x48a   :  { %v419_v28 = vadd.f32 1e-05, %v417_v27 }
 0x48c   :  { %1046 = vrsqrt.f32 %v419_v28 }
 0x496   :  { %v1047_v33 = vpop.eup %1046 }
 0x497   :  { %v421_v35 = vmul.f32 %v1047_v33, %v418_v32 }
 0x499   :  { %v426_v36 = vmul.f32 %v425_v31, %v421_v35 }
 0x49b   :  { %v1373_v37 = vadd.f32 %v430_v34, %v426_v36 }
 0x49d   :  { %v563_v38 = vpack.c.bf16 %v1373_v37, %v1373_v37  ;;  %v457_v40 = vmul.f32 5.0, %v1373_v37 }
 0x49f   :  { %971 = vmatmul.mubr.msk.bf16.vlgmr.msra.gmra.mrb[12].mxu0 %vm160_vm2, %v563_v38  ;;  %v461_v41 = vsel %vm160_vm2, %v457_v40, inf  ;;  %v458_v42 = vsel %vm160_vm2, %v457_v40, -inf  ;;  %v464_v43 = vsub.f32 0.0, %v457_v40 }
 0x4a0   :  { %462 = vmin.xlane.f32.xlu1 %v461_v41  ;;  %994 = vmatprep.mubr.msk.f32.mxu0 %vm1160_vm0, %v1159_v0 }
 0x4a4   :  { %459 = vmax.xlane.f32.xlu1 %v458_v42  ;;  %v728_v42 = vld [vmem:[#allocation7] sm:$0xff] }
 0x4b5   :  { %466 = vrot.lane.b32.xlu1 %v464_v43, %s1161_s2  ;;  %v729_v43 = vld [vmem:[#allocation7 + $0x8] sm:$0xff] }
 0x4b6   :  { %v998_v45 = vpack.c.bf16 %v729_v43, %v728_v42 }
 0x4b8   :  { %999 = vmatpush3.bf16.msra.mxu0 %v998_v45 }
 0x4b9   :  { %1000 = vmatprep.subr.bf16.mxu0 %v1164_v46 }
 0x52d   :  { %v463_v49 = vpop.xlane.xlu1 %462 }
 0x52e   :  { %v470_v51 = vsub.f32 0.0, %v463_v49 }
 0x531   :  { %v460_v50 = vpop.xlane.xlu1 %459 }
 0x532   :  { %v471_v53 = vsel %vm136_vm3, %v460_v50, %v470_v51 }
 0x533   :  { %v547_v14 = vadd.f32 %v546_v11, %v471_v53 }
 0x535   :  { %v467_v52 = vpop.permute.xlu1 %466 }
 0x536   :  { %v469_v55 = vsel %vm160_vm2, %v457_v40, %v467_v52 }
 0x537   :  { %v472_v56 = vsub.f32 %v469_v55, %v471_v53 }
 0x539   :  { %v473_v58 = vmul.f32 1.442695, %v472_v56 }
 0x53b   :  { %1048 = vpow2.f32 %v473_v58  ;;  %v721_v58 = vrot.slane %v1417_v7, %v424_v29 }
 0x545   :  { %v1049_v59 = vpop.eup %1048 }
 0x546   :  { %v475_v60 = vpack.c.bf16 %v1049_v59, %v1049_v59 }
 0x548   :  { %963 = vmatmul.mubr.msk.bf16.vlgmr.msra.gmra.mrb[4].mxu1 %vm203_vm4, %v475_v60 }
 0x549   :  { %982 = vmatprep.mubr.msk.bf16.mxu1 %vm1160_vm0, %v1159_v0  ;;  %975 = vmatpush3.bf16.msra.mxu1 %v1034_v22 }
 0x54a   :  { %976 = vmatprep.subr.bf16.mxu1 %v1159_v0 }
 0x54d   :  { %977 = vmatpush3.bf16.msra.mxu1 %v1035_v2 }
 0x54e   :  { %978 = vmatprep.subr.bf16.mxu1 %v1159_v0 }
 0x551   :  { %979 = vmatpush3.bf16.msra.mxu1 %v1036_v10 }
 0x552   :  { %980 = vmatprep.subr.bf16.mxu1 %v1159_v0  ;;  %v567_v0 = vrot.slane %v1417_v7, %v270_v57  ;;  %v634_v57 = vrot.slane %v1417_v7, %v337_v9  ;;  %v730_v9 = vld [vmem:[#allocation7 + $0x10] sm:$0xff] }
 0x553   :  { %v1001_v48 = vpack.c.bf16 %v731_v47, %v730_v9 }
 0x555   :  { %981 = vmatpush3.bf16.msra.mxu1 %v1037_v13  ;;  %1002 = vmatpush3.bf16.msra.mxu0 %v1001_v48 }
 0x572   :  { %v617_v61 = vpop.f32.mrb[12].mxu0 }
 0x573   :  { %v972_v62 = vpop.f32.mrb[13].mxu0  ;;  %v618_v44 = vadd.f32 %v617_v61, %v567_v0  ;;  %v726_v61 = vrot.slane %v1417_v7, %v429_v30 }
 0x574   :  { %v620_v63 = vpop.f32.mrb[14].mxu0 }
 0x575   :  { %v973_v1 = vpop.f32.mrb[15].mxu0  ;;  %v875_v19 = vmul.f32 -1.442695, %v618_v44 }
 0x576   :  { %v881_v1 = vld [vmem:[%s1474_s8] ss:$0 sm:$0xff] }
 0x61b   :  { %v537_v3 = vpop.f32.mrb[4].mxu1 }
 0x61c   :  { %1050 = vlog2.f32 %v537_v3  ;;  %v964_v4 = vpop.f32.mrb[5].mxu1 }
 0x61d   :  { %v540_v5 = vpop.f32.mrb[6].mxu1  ;;  %1052 = vpow2.f32 %v875_v19 }
 0x61e   :  { %v965_v6 = vpop.f32.mrb[7].mxu1 }
 0x626   :  { %v1051_v12 = vpop.eup %1050 }
 0x627   :  { %v549_v15 = vmul.f32 0.6931472, %v1051_v12  ;;  %v1053_v20 = vpop.eup %1052 }
 0x628   :  { %v626_v21 = vadd.f32 1.0, %v1053_v20 }
 0x629   :  { %v550_v16 = vadd.f32 %v549_v15, %v547_v14 }
 0x62a   :  { %1054 = vrcp.f32 %v626_v21 }
 0x62b   :  { %v551_v17 = vmul.f32 0.2, %v550_v16 }
 0x62d   :  { %v552_v18 = vmul.f32 %v551_v17, %v1337_v54 }
 0x62f   :  { %557 = vrot.lane.b32.xlu1 %v552_v18, %s1161_s2  ;;  %554 = vrot.lane.b32.xlu0 %v552_v18, %s1163_s7  ;;  %s1165_s2 = smov [#allocation8]  }
 0x630   :  { %s819_s23 = sshll.u32 %s1165_s2, 4  ;;  %s820_s23 = int_to_ptr.vmem [resolvable:$true] %s819_s23 }
 0x631   :  { %s1124_s24 = scalar_lea.vmem %s820_s23, 128  ;;  %p1129_p11 = scmp.lt.s32.totalorder %s820_s23, %s820_s23 }
 0x632   :  { %p1125_p10 = scmp.ne.s32.totalorder %s820_s23, %s1124_s24  ;;  %p1130_p12 = scmp.lt.s32.totalorder %s1124_s24, %s1124_s24 }
 0x634   :  { %v1055_v27 = vpop.eup %1054  ;;  %p1131_p13 = por %p1130_p12, %p1129_p11 }
 0x636   :  { %p1132_p0 = pnand %p1131_p13, %p1125_p10 }
 0x6a1   :  { %v558_v8 = vpop.permute.xlu1 %557  ;;  %v555_v23 = vpop.permute.xlu0 %554 }
 0x6a2   :  { %v560_v24 = vsel %vm160_vm2, %v555_v23, %v558_v8 }
 0x6a3   :  { %v561_v25 = vmul.f32 %v560_v24, %v1337_v54 }
 0x6a5   :  { %v562_v26 = vsub.f32 %v552_v18, %v561_v25 }
 0x6a7   :  { %v629_v28 = vmul.f32 %v1055_v27, %v562_v26 }
 0x6a9   :  { %v630_v31 = vpack.c.bf16 %v629_v28, %v629_v28 }
 0x6ab   :  { %983 = vmatmul.mubr.msk.bf16.vlgmr.msra.gmra.mrb[8].mxu1 %vm203_vm4, %v630_v31 }
 0x77e   :  { %v696_v32 = vpop.f32.mrb[8].mxu1 }
 0x77f   :  { %v697_v33 = vadd.f32 %v696_v32, %v634_v57  ;;  %v984_v34 = vpop.f32.mrb[9].mxu1 }
 0x780   :  { %v699_v35 = vpop.f32.mrb[10].mxu1 }
 0x781   :  { %v702_v36 = vadd.f32 %v697_v33, %v1373_v37  ;;  %v985_v38 = vpop.f32.mrb[11].mxu1 }
 0x783   :  { %v703_v40 = vsel %vm160_vm2, %v702_v36, 0.0  ;;  %v706_v54 = vmul.f32 %v702_v36, %v702_v36 }
 0x784   :  { %704 = vadd.xlane.f32.xlu1 %v703_v40 }
 0x785   :  { %v707_v41 = vsel %vm160_vm2, %v706_v54, 0.0 }
 0x786   :  { %708 = vadd.xlane.f32.xlu0 %v707_v41 }
 0x811   :  { %v705_v37 = vpop.xlane.xlu1 %704 }
 0x812   :  { %v710_v49 = vmul.f32 0.03125, %v705_v37 }
 0x813   :  { %v709_v50 = vpop.xlane.xlu0 %708 }
 0x814   :  { %v712_v51 = vmul.f32 %v710_v49, %v710_v49  ;;  %v711_v52 = vmul.f32 0.03125, %v709_v50  ;;  %v714_v56 = vsub.f32 %v702_v36, %v710_v49 }
 0x816   :  { %v713_v53 = vsub.f32 %v711_v52, %v712_v51 }
 0x818   :  { %v715_v55 = vadd.f32 1e-05, %v713_v53 }
 0x81a   :  { %1056 = vrsqrt.f32 %v715_v55 }
 0x824   :  { %v1057_v59 = vpop.eup %1056 }
 0x825   :  { %v717_v60 = vmul.f32 %v1057_v59, %v714_v56 }
 0x827   :  { %v722_v62 = vmul.f32 %v721_v58, %v717_v60 }
 0x829   :  { %v727_v63 = vadd.f32 %v726_v61, %v722_v62 }
 0x82b   :  { %995 = vmatmul.mubr.msk.f32.vlgmr.msra.gmra.mrb[16].mxu0 %vm160_vm2, %v727_v63 }
 0x8fe   :  { %v808_v22 = vpop.f32.mrb[16].mxu0 }
 0x8ff   :  { %v809_v2 = vadd.f32 %v881_v1, %v808_v22  ;;  %v996_v3 = vpop.f32.mrb[17].mxu0 }
 0x901   :  { %812 = vst [vmem:[#allocation8] sm:$0xff] %v809_v2 }
 0x902   :  { %1135 = shalt.err (!%p1132_p0)
}
 0x903   :  { %s1136_s26 = scalar_lea.hbm %s1475_s9, 128 }
 0x904   :  { %p1137_p1 = scmp.ne.s32.totalorder %s1475_s9, %s1136_s26  ;;  %p1140_p2 = scmp.lt.u32.totalorder %s1136_s26, %s1475_s9 }
 0x906   :  { %p1142_p3 = pnand %p1140_p2, %p1137_p1 }
 0x908   :  { %1145 = shalt.err (!%p1142_p3)
}
 0x909   :  { %822 = dma.vmem_to_hbm [thread:$0]  %s820_s23, 128, %s1475_s9, [#allocation4]  }
 0x90a   :  { %1150 = dma.done.wait [#allocation4], 128  }
 0x90b   :  { %1151 = vsyncadd [#allocation4], 4294967168 }
 0x90c   :  { %826 = vsyncpa [#allocation3], 1 }
 0x90d   :  { %827 = vsyncpa [#allocation6], 1 }
 0x90e   :  { %828 = vsyncpa [#allocation4], 1 }

</bundles_post_ra>
